<compile_context>
chip_gen: v6e
topology: v6e:2x2x1
jax: 0.10.0
libtpu: 0.0.40
codegen_flags: <defaults>
</compile_context>

<pallas_src>
import functools

import jax
import jax.numpy as jnp
from jax.experimental import pallas as pl
from jax.experimental.pallas import tpu as pltpu

_MIB = 1 << 20
# Total budget for the double-buffered x + out blocks (2 bufs each), safe on
# v5e/v6e (128 MiB physical) and v7x (64 MiB physical, 32 MiB default scoped).
_BLOCK_BYTE_BUDGET = 20 * _MIB


def spatial_attention_kernel(x_ref, w_ref, b_ref, o_ref, *, channels, groups_per_block):
    # x_ref: (G*C, T) VMEM, native dtype -- G whole batches folded onto sublanes
    # w_ref: (G*C, 1) VMEM, f32          -- row g*C + c carries conv weight w[c]
    # b_ref: (1,)     SMEM, f32          -- conv bias scalar
    # o_ref: (G*C, T) VMEM, same dtype as x
    bias = b_ref[0]
    # Gate multiply in native dtype for sub-32-bit I/O (bf16 VPU on v6e/v7x);
    # the channel reduce + sigmoid always run in f32.
    native_gate = jnp.dtype(o_ref.dtype).itemsize < 4

    x = x_ref[...]                                     # (G*C, T) native dtype
    w = w_ref[...]                                     # (G*C, 1) f32

    parts = []
    for g in range(groups_per_block):                  # static unroll, G kept small by row tiling
        lo = g * channels
        grp = x[lo:lo + channels, :]                   # (C, T) native dtype
        grp_f32 = grp.astype(jnp.float32)
        logit = jnp.sum(grp_f32 * w[lo:lo + channels, :], axis=0, keepdims=True) + bias  # (1,T) f32
        att = jax.nn.sigmoid(logit)                    # EUP, f32
        if native_gate:
            gated = grp * att.astype(o_ref.dtype)      # bf16 VPU gate, no full-tile f32 upcast kept
        else:
            gated = (grp_f32 * att).astype(o_ref.dtype)
        parts.append(gated)

    # One dense (G*C, T) store; HBM writeback of the block is lane-dense either way.
    o_ref[...] = parts[0] if groups_per_block == 1 else jnp.concatenate(parts, axis=0)


def _pick_batch_groups(batch, channels, itemsize, row_cap=1024):
    """Batches per row block: divisor of `batch`; rows multiple of the sublane pack
    (8/16/32 for f32/bf16/int8) unless the block spans all rows (always legal)."""
    sublane_pack = 8 * (4 // itemsize)
    for gb in range(batch, 0, -1):
        rows = gb * channels
        if batch % gb == 0 and rows <= row_cap and (rows % sublane_pack == 0 or gb == batch):
            return gb
    return batch


def spatial_attention(x_nchw, conv_weight, conv_bias):
    """x_nchw: (B, C, H, W). conv_weight: (1, C, 1, 1). conv_bias: (1,)."""
    B, C, H, W = x_nchw.shape
    HW = H * W
    BC = B * C
    itemsize = jnp.dtype(x_nchw.dtype).itemsize

    x_flat = x_nchw.reshape(BC, HW)                                   # free (contiguous) reshape
    w_tiled = jnp.tile(conv_weight.reshape(C, 1).astype(jnp.float32), (B, 1))  # (BC, 1)
    bias = conv_bias.reshape(1).astype(jnp.float32)                   # (1,)

    # ---- row (sublane) tiling: whole-batch groups, rows = gb * C ----
    gb = _pick_batch_groups(B, C, itemsize)
    block_rows = gb * C
    num_row_blocks = B // gb

    # ---- lane tiling: sized by VMEM byte budget; partial trailing block allowed ----
    if HW <= 128:
        tile_hw = HW                                                  # full extent (always legal)
    else:
        per_block_budget = _BLOCK_BYTE_BUDGET // 4                    # x + out, double-buffered
        budget_tile = max(128, (per_block_budget // (block_rows * itemsize)) // 128 * 128)
        tile_hw = HW if budget_tile >= HW else budget_tile
        # Guarantee >=2 parallel grid steps (v7x has 2 TCs; this op is HBM-bound).
        if num_row_blocks * pl.cdiv(HW, tile_hw) < 2 and HW >= 256:
            tile_hw = max(128, pl.cdiv(pl.cdiv(HW, 2), 128) * 128)
    num_lane_blocks = pl.cdiv(HW, tile_hw)
    grid = (num_row_blocks, num_lane_blocks)

    # Explicit VMEM limit with headroom over the actual block footprint.
    block_bytes = block_rows * tile_hw * itemsize
    footprint = 4 * block_bytes + 2 * max(block_rows, 8) * 128 * 4 + _MIB
    vmem_limit = int(min(48 * _MIB, max(32 * _MIB, footprint + 4 * _MIB)))

    cost = pl.CostEstimate(
        flops=3 * BC * HW,                       # weighted mul + reduce add + gate mul
        transcendentals=B * HW,                  # sigmoid per spatial position per batch
        bytes_accessed=2 * BC * HW * itemsize + BC * 4 + 4,
    )

    kernel = functools.partial(spatial_attention_kernel, channels=C, groups_per_block=gb)

    out_flat = pl.pallas_call(
        kernel,
        out_shape=jax.ShapeDtypeStruct((BC, HW), x_flat.dtype),
        grid_spec=pltpu.PrefetchScalarGridSpec(
            num_scalar_prefetch=0,
            grid=grid,
            in_specs=[
                pl.BlockSpec((block_rows, tile_hw), lambda i, j: (i, j)),     # x: row+lane tiled
                pl.BlockSpec((block_rows, 1), lambda i, j: (i, 0)),           # w: per-row-block
                pl.BlockSpec(memory_space=pltpu.MemorySpace.SMEM),            # bias scalar
            ],
            out_specs=pl.BlockSpec((block_rows, tile_hw), lambda i, j: (i, j)),
        ),
        compiler_params=pltpu.CompilerParams(
            dimension_semantics=("parallel", "parallel"),
            vmem_limit_bytes=vmem_limit,
        ),
        cost_estimate=cost,
    )(x_flat, w_tiled, bias)

    return out_flat.reshape(B, C, H, W)


def spatial_attention_ref(x_nchw, conv_weight, conv_bias):
    # pure-JAX reference: 1x1 conv over channel dim, sigmoid, gate (f32 compute)
    w = conv_weight.reshape(-1).astype(jnp.float32)
    xf = x_nchw.astype(jnp.float32)
    logit = jnp.einsum("bchw,c->bhw", xf, w) + conv_bias.astype(jnp.float32)[0]
    att = jax.nn.sigmoid(logit)[:, None, :, :]   # (B, 1, H, W)
    return xf * att


if __name__ == "__main__":
    B, C, H, W = 2, 4, 16, 16
    key = jax.random.PRNGKey(0)
    kx, kw, kb = jax.random.split(key, 3)

    x = jax.random.normal(kx, (B, C, H, W), dtype=jnp.float32)
    # Conv2d(in_channels=C, out_channels=1, kernel_size=1) parameters
    conv_weight = jax.random.normal(kw, (1, C, 1, 1), dtype=jnp.float32) * 0.1
    conv_bias = jax.random.normal(kb, (1,), dtype=jnp.float32) * 0.1

    # f32 path
    out = jax.block_until_ready(spatial_attention(x, conv_weight, conv_bias))
    ref = spatial_attention_ref(x, conv_weight, conv_bias)
    assert out.shape == (B, C, H, W)
    assert jnp.allclose(out, ref, atol=1e-5, rtol=1e-5), "f32 mismatch vs reference"

    # bf16 I/O path (mem-bound op -> half HBM bytes); reduce/sigmoid stay f32,
    # gate multiply runs in bf16 in-kernel.
    x_bf16 = x.astype(jnp.bfloat16)
    out_bf16 = jax.block_until_ready(spatial_attention(x_bf16, conv_weight, conv_bias))
    ref_bf16 = spatial_attention_ref(x_bf16, conv_weight, conv_bias)
    assert out_bf16.dtype == jnp.bfloat16
    assert jnp.allclose(out_bf16.astype(jnp.float32), ref_bf16, atol=5e-2, rtol=5e-2), \
        "bf16 mismatch vs reference"

    print("KERNEL_OK")
</pallas_src>

<mosaic_0001>
module attributes {stable_mosaic.version = 11 : i64} {
  func.func @spatial_attention_kernel(%arg0: i32, %arg1: i32, %arg2: memref<8x128xf32, #tpu.memory_space<vmem>>, %arg3: memref<8x1xf32, #tpu.memory_space<vmem>>, %arg4: memref<1xf32, #tpu.memory_space<smem>>, %arg5: memref<8x128xf32, #tpu.memory_space<vmem>>) attributes {dimension_semantics = [#tpu.dimension_semantics<parallel>, #tpu.dimension_semantics<parallel>], iteration_bounds = array<i64: 1, 2>, scalar_prefetch = 0 : i64, scratch_operands = 0 : i64, tpu.core_type = #tpu.core_type<tc>, window_params = [{transform_indices = @transform_0, window_bounds = array<i64: 8, 128>}, {transform_indices = @transform_1, window_bounds = array<i64: 8, 1>}, {transform_indices = @transform_2, window_bounds = array<i64: 1>}, {transform_indices = @transform_3, window_bounds = array<i64: 8, 128>}]} {
    %c0 = arith.constant 0 : index
    %0 = memref.load %arg4[%c0] : memref<1xf32, #tpu.memory_space<smem>>
    %c0_0 = arith.constant 0 : index
    %c0_1 = arith.constant 0 : index
    %1 = vector.load %arg2[%c0_0, %c0_1] : memref<8x128xf32, #tpu.memory_space<vmem>>, vector<8x128xf32>
    %c0_2 = arith.constant 0 : index
    %c0_3 = arith.constant 0 : index
    %2 = vector.load %arg3[%c0_2, %c0_3] : memref<8x1xf32, #tpu.memory_space<vmem>>, vector<8x1xf32>
    %3 = vector.extract_strided_slice %1 {offsets = [0, 0], sizes = [4, 128], strides = [1, 1]} : vector<8x128xf32> to vector<4x128xf32>
    %4 = vector.extract_strided_slice %2 {offsets = [0, 0], sizes = [4, 1], strides = [1, 1]} : vector<8x1xf32> to vector<4x1xf32>
    %5 = vector.broadcast %4 : vector<4x1xf32> to vector<4x128xf32>
    %6 = arith.mulf %3, %5 : vector<4x128xf32>
    %cst = arith.constant dense<0.000000e+00> : vector<128xf32>
    %7 = vector.multi_reduction <add>, %6, %cst [0] : vector<4x128xf32> to vector<128xf32>
    %8 = vector.shape_cast %7 : vector<128xf32> to vector<1x128xf32>
    %9 = vector.broadcast %0 : f32 to vector<1x128xf32>
    %10 = arith.addf %8, %9 : vector<1x128xf32>
    %11 = arith.negf %10 : vector<1x128xf32>
    %12 = math.exp %11 : vector<1x128xf32>
    %cst_4 = arith.constant 1.000000e+00 : f32
    %13 = vector.broadcast %cst_4 : f32 to vector<1x128xf32>
    %14 = arith.addf %13, %12 : vector<1x128xf32>
    %15 = arith.divf %13, %14 : vector<1x128xf32>
    %16 = vector.broadcast %15 : vector<1x128xf32> to vector<4x128xf32>
    %17 = arith.mulf %3, %16 : vector<4x128xf32>
    %18 = vector.extract_strided_slice %1 {offsets = [4, 0], sizes = [4, 128], strides = [1, 1]} : vector<8x128xf32> to vector<4x128xf32>
    %19 = vector.extract_strided_slice %2 {offsets = [4, 0], sizes = [4, 1], strides = [1, 1]} : vector<8x1xf32> to vector<4x1xf32>
    %20 = vector.broadcast %19 : vector<4x1xf32> to vector<4x128xf32>
    %21 = arith.mulf %18, %20 : vector<4x128xf32>
    %cst_5 = arith.constant dense<0.000000e+00> : vector<128xf32>
    %22 = vector.multi_reduction <add>, %21, %cst_5 [0] : vector<4x128xf32> to vector<128xf32>
    %23 = vector.shape_cast %22 : vector<128xf32> to vector<1x128xf32>
    %24 = vector.broadcast %0 : f32 to vector<1x128xf32>
    %25 = arith.addf %23, %24 : vector<1x128xf32>
    %26 = arith.negf %25 : vector<1x128xf32>
    %27 = math.exp %26 : vector<1x128xf32>
    %cst_6 = arith.constant 1.000000e+00 : f32
    %28 = vector.broadcast %cst_6 : f32 to vector<1x128xf32>
    %29 = arith.addf %28, %27 : vector<1x128xf32>
    %30 = arith.divf %28, %29 : vector<1x128xf32>
    %31 = vector.broadcast %30 : vector<1x128xf32> to vector<4x128xf32>
    %32 = arith.mulf %18, %31 : vector<4x128xf32>
    %33 = tpu.concatenate %17, %32 in 0 : vector<4x128xf32>, vector<4x128xf32> -> vector<8x128xf32>
    %c0_7 = arith.constant 0 : index
    %c0_8 = arith.constant 0 : index
    %34 = vector.load %arg5[%c0_7, %c0_8] : memref<8x128xf32, #tpu.memory_space<vmem>>, vector<8x128xf32>
    tpu.vector_store %arg5[%c0_7, %c0_8], %33 {strides = array<i32>} : memref<8x128xf32, #tpu.memory_space<vmem>>, vector<8x128xf32>,
    return
  }
  func.func @transform_0(%arg0: i32, %arg1: i32) -> (i32, i32) {
    %c0_i32 = arith.constant 0 : i32
    return %arg0, %arg1 : i32, i32
  }
  func.func @transform_1(%arg0: i32, %arg1: i32) -> (i32, i32) {
    %c0_i32 = arith.constant 0 : i32
    %c0_i32_0 = arith.constant 0 : i32
    return %arg0, %c0_i32 : i32, i32
  }
  func.func @transform_2(%arg0: i32, %arg1: i32) -> i32 {
    %c0_i32 = arith.constant 0 : i32
    %c0_i32_0 = arith.constant 0 : i32
    return %c0_i32 : i32
  }
  func.func @transform_3(%arg0: i32, %arg1: i32) -> (i32, i32) {
    %c0_i32 = arith.constant 0 : i32
    return %arg0, %arg1 : i32, i32
  }
}

</mosaic_0001>

<bundles_post_ra>
// kernel: tpu_custom_call.1
= control target key start
LH: loop header
LB: loop body
LE: loop exit
PB: predicated region body
PF: predicated region fallthrough
CT: control target
= control target key end

     0   :  { %s755_s0 = inlined_call_operand.hbm [shape: f32[8,256], index: 0, kind: input, shape index: {}]   ;;  %s756_s1 = inlined_call_operand.vmem [shape: f32[8,1], index: 1, kind: input, shape index: {}]   ;;  %s757_s2 = inlined_call_operand.<no memory space> [shape: f32[1], index: 2, kind: input, shape index: {}]   ;;  %s758_s3 = inlined_call_operand.hbm [shape: f32[8,256], index: 3, kind: output, shape index: {}]  }
   0x1   :  { %8 = sst [smem:[#allocation2]] %s757_s2 }
   0x2   :  { %9 = vsyncpa [#allocation4], 0 }
   0x3   :  { %11 = vsyncpa [#allocation4 + $0x1], 0 }
   0x4   :  { %12 = vsyncpa [#allocation5], 0 }
   0x5   :  { %14 = vsyncpa [#allocation5 + $0x1], 0  ;;  %s605_s14 = smov 0   ;;  %s607_s15 = smov 0  }
   0x6   :  { %s609_s16 = smov 0   ;;  %s611_s17 = smov 0  }
   0x7   :  { %s613_s18 = smov 0   ;;  %s615_s19 = smov 0  }
   0x8 LB: > { %s381_s2 = sadd.s32 4294967295, %s577_s19   ;;  %s382_s20 = sadd.s32 4294967294, %s577_s19   ;;  %s577_s19 = sphi %s615_s19, %s20_s19   ;;  %s573_s18 = sphi %s613_s18, %s770_s18   ;;  %s569_s17 = sphi %s611_s17, %s769_s17   ;;  %s565_s16 = sphi %s609_s16, %s768_s16   ;;  %s561_s15 = sphi %s607_s15, %s767_s15   ;;  %s557_s14 = sphi %s605_s14, %s766_s14  }
   0x9   : > { %s29_s21 = sadd.s32 1, %s573_s18  ;;  %s41_s22 = sadd.s32 1, %s565_s16 }
   0xa   : > { %p30_p0 = scmp.ge.s32.totalorder %s29_s21, 2  ;;  %p48_p1 = scmp.ne.s32.totalorder %s565_s16, %s561_s15 }
   0xb   : > { %p49_p2 = scmp.eq.s32.totalorder %s577_s19, 0  ;;  %p54_p3 = scmp.ne.s32.totalorder %s561_s15, %s557_s14 }
   0xc   : > { %s772_s21 = smov (%p30_p0, %s29_s21), 0  ;;  %p55_p5 = scmp.eq.s32.totalorder %s381_s2, 0 }
   0xd   : > { %p646_p4 = por %p49_p2, %p48_p1  ;;  %s37_s24 = ssub.s32 %s573_s18, %s772_s21 }
   0xe   : > { %p127_p6 = scmp.eq.s32.totalorder %s381_s2, 1  ;;  %p39_p7 = scmp.eq.s32.totalorder %s37_s24, 0 }
   0xf   : > { %p652_p8 = por %p55_p5, %p54_p3  ;;  %p133_p10 = scmp.eq.s32.totalorder %s382_s20, 1 }
  0x10   : > { %p656_p9 = por %p127_p6, %p48_p1  ;;  %p409_p13 = scmp.lt.s32.totalorder %s577_s19, 2 }
  0x11   : > { %s661_s27 = scalar_select %p39_p7, %s565_s16, %s41_s22  }
  0x12   : > { %p663_p11 = por %p133_p10, %p54_p3  ;;  %s163_s29 = sand.u32 1, %s565_s16  }
  0x13   : > { %s386_s30 = sshll.u32 %s163_s29, 3  ;;  %s387_s4 = sshll.u32 %s573_s18, 7 }
  0x14   : > { %s762_s28 = scalar_select %p663_p11, 1, 0 }
  0x15   : > { %s174_s7 = scalar_lea.hbm %s755_s0, %s387_s4  ;;  %s167_s8 = scalar_lea.vmem [#allocation3], %s386_s30 }
  0x16   : > { %s176_s9 = sshll.u32 %s167_s8, 4  ;;  %p676_p0 = pnand %p409_p13, %p646_p4  ;;  %s177_s9 = int_to_ptr.vmem [resolvable:$true] %s176_s9 }
  0x17   : > { %p388_p1 = scmp.ge.s32.totalorder %s577_s19, 1  ;;  %p181_p2 = scmp.lt.s32.totalorder %s577_s19, 3 }
  0x18   : > { %s164_s11 = scalar_lea.sflag [#allocation4], %s163_s29  ;;  %p471_p3 = pneg %p676_p0 }
  0x19   : > { %s482_s12 = scalar_lea.vmem %s177_s9, 128  ;;  %s579_s13 = smov [#allocation3]  }
  0x1a   : > { %p483_p5 = scmp.ne.s32.totalorder %s177_s9, %s482_s12  ;;  %s487_s2 = sshll.u32 %s579_s13, 4  ;;  %s488_s2 = int_to_ptr.vmem [resolvable:$false] %s487_s2 }
  0x1b   : > { %s489_s20 = scalar_lea.vmem %s488_s2, 256  ;;  %p490_p10 = scmp.lt.s32.totalorder %s177_s9, %s488_s2 }
  0x1c   : > { %p485_p6 = pnand %p483_p5, %p471_p3  ;;  %p491_p12 = scmp.lt.s32.totalorder %s489_s20, %s482_s12 }
  0x1e   : > { %p486_p7 = pneg %p485_p6  ;;  %p492_p4 = por %p491_p12, %p490_p10 }
  0x20   : > { %p493_p13 = pnand %p492_p4, %p486_p7 }
  0x22   : > { %496 = shalt.err (!%p493_p13)
}
  0x23   : > { %404 = dma.hbm_to_vmem [thread:$0]  (!%p676_p0), %s174_s7, 128, %s177_s9, %s164_s11  }
  0x24   : > { %p182_p11 = pnand %p388_p1, %p181_p2 }
  0x25   : > { %s691_s22 = sand.u32 (!%p182_p11), 1, %s561_s15  }
  0x26   : > { %185 = sbr.rel (%p182_p11) target bundleno = 237 (0xed), region = 32  ;;  %s389_s23 = sshll.u32 (!%p182_p11), %s691_s22, 3 }
  0x27   : > { %s188_s24 = scalar_lea.sflag (!%p182_p11), [#allocation4], %s691_s22  ;;  %s191_s29 = scalar_lea.vmem (!%p182_p11), [#allocation3], %s389_s23 }
  0x2b   : > { %548 = dma.done.wait (%p652_p8), %s188_s24, 128  }
  0x2c   : > { %550 = vsyncadd (%p652_p8), %s188_s24, 4294967168  ;;  %v580_v0 = vmov 0   ;;  %v224_v1 = vld [vmem:[%s756_s1] sm:$0xff]  ;;  %vm231_vm0 = vcmask 1043456   ;;  %s222_s5 = sld [smem:[#allocation2]]  ;;  %s394_s25 = sshll.u32 %s569_s17, 7 }
  0x2d   : > { %460 = vset.pattern.permute.xlu0 %v580_v0  ;;  %v223_v2 = vld [vmem:[%s191_s29] sm:$0xff]  ;;  %s217_s6 = scalar_lea.vmem [#allocation6], %s389_s23  ;;  %s712_s10 = scalar_lea.hbm %s758_s3, %s394_s25 }
  0x2e   : > { %227 = vperm.xlu0 %460, %v224_v1   ;;  %s284_s7 = sshll.u32 %s217_s6, 4  ;;  %s269_s11 = scalar_lea.sflag [#allocation5], %s691_s22  ;;  %s285_s7 = int_to_ptr.vmem [resolvable:$true] %s284_s7 }
  0x2f   : > { %s497_s12 = scalar_lea.vmem %s285_s7, 128  ;;  %s581_s17 = smov [#allocation6]  }
  0x30   : > { %p498_p8 = scmp.ne.s32.totalorder %s285_s7, %s497_s12  ;;  %s501_s13 = sshll.u32 %s581_s17, 4  ;;  %s502_s13 = int_to_ptr.vmem [resolvable:$false] %s501_s13 }
  0x31   : > { %s503_s2 = scalar_lea.vmem %s502_s13, 256  ;;  %p504_p0 = scmp.lt.s32.totalorder %s285_s7, %s502_s13 }
  0x32   : > { %v239_v17 = vstv %s222_s5  ;;  %p499_p11 = pnand %p498_p8, %p656_p9  ;;  %p505_p1 = scmp.lt.s32.totalorder %s503_s2, %s497_s12 }
  0x34   : > { %p500_p12 = pneg %p499_p11  ;;  %p506_p2 = por %p505_p1, %p504_p0 }
  0x36   : > { %p507_p3 = pnand %p506_p2, %p500_p12 }
  0xa9   : > { %v228_v3 = vpop.permute.xlu0 %227 }
  0xaa   : > { %v230_v4 = vmul.f32 %v228_v3, %v223_v2 }
  0xac   : > { %v232_v5 = vsel %vm231_vm0, %v230_v4, 0.0  ;;  %v249_v6 = vrot.slane %v230_v4, 4 }
  0xad   : > { %v233_v7 = vrot.slane %v232_v5, 4 }
  0xae   : > { %v251_v8 = vsel %vm231_vm0, %v249_v6, 0.0 }
  0xaf   : > { %v234_v9 = vadd.f32 %v233_v7, %v232_v5  ;;  %v252_v10 = vrot.slane %v251_v8, 4 }
  0xb1   : > { %v235_v11 = vrot.slane %v234_v9, 2  ;;  %v253_v12 = vadd.f32 %v252_v10, %v251_v8 }
  0xb3   : > { %v236_v13 = vadd.f32 %v235_v11, %v234_v9  ;;  %v254_v14 = vrot.slane %v253_v12, 2 }
  0xb5   : > { %v237_v15 = vrot.slane %v236_v13, 1  ;;  %v255_v16 = vadd.f32 %v254_v14, %v253_v12 }
  0xb7   : > { %v238_v18 = vadd.f32 %v237_v15, %v236_v13  ;;  %v256_v19 = vrot.slane %v255_v16, 1 }
  0xb9   : > { %v240_v20 = vadd.f32 %v239_v17, %v238_v18  ;;  %v257_v21 = vadd.f32 %v256_v19, %v255_v16 }
  0xbb   : > { %v391_v22 = vmul.f32 -1.442695, %v240_v20  ;;  %v258_v23 = vadd.f32 %v257_v21, %v239_v17 }
  0xbd   : > { %461 = vpow2.f32 %v391_v22  ;;  %v392_v24 = vmul.f32 -1.442695, %v258_v23 }
  0xbf   : > { %463 = vpow2.f32 %v392_v24 }
  0xca   : > { %v462_v25 = vpop.eup %461 }
  0xcb   : > { %v244_v26 = vadd.f32 1.0, %v462_v25 }
  0xcc   : > { %v464_v27 = vpop.eup %463 }
  0xcd   : > { %465 = vrcp.f32 %v244_v26  ;;  %v262_v28 = vadd.f32 1.0, %v464_v27 }
  0xcf   : > { %467 = vrcp.f32 %v262_v28 }
  0xda   : > { %v466_v29 = vpop.eup %465 }
  0xdb   : > { %v247_v31 = vmul.f32 %v466_v29, %v223_v2 }
  0xdc   : > { %v468_v30 = vpop.eup %467 }
  0xdd   : > { %v265_v32 = vmul.f32 %v468_v30, %v223_v2 }
  0xdf   : > { %v266_v33 = vsel %vm231_vm0, %v247_v31, %v265_v32 }
  0xe0   : > { %267 = vst [vmem:[%s217_s6] sm:$0xff] %v266_v33 }
  0xe1   : > { %510 = shalt.err (!%p507_p3)
}
  0xe2   : > { %s511_s20 = scalar_lea.hbm %s712_s10, 128  ;;  %s515_s24 = scalar_lea.hbm %s758_s3, 256 }
  0xe3   : > { %p512_p5 = scmp.ne.s32.totalorder %s712_s10, %s511_s20  ;;  %p516_p10 = scmp.lt.s32.totalorder %s712_s10, %s758_s3 }
  0xe4   : > { %p517_p4 = scmp.lt.s32.totalorder %s515_s24, %s511_s20 }
  0xe5   : > { %p513_p6 = pnand %p512_p5, %p656_p9 }
  0xe6   : > { %p518_p13 = por %p517_p4, %p516_p10 }
  0xe7   : > { %p514_p7 = pneg %p513_p6 }
  0xe9   : > { %p519_p8 = pnand %p518_p13, %p514_p7 }
  0xeb   : > { %522 = shalt.err (!%p519_p8)
}
  0xec   : > { %399 = dma.vmem_to_hbm [thread:$0]  (%p656_p9), %s285_s7, 128, %s712_s10, %s269_s11  }
  0xed PF: > { %s296_s4 = sand.u32 1, %s557_s14   ;;  %p764_p11 = scmp.ne.s32.totalorder %s762_s28, 0 }
  0xee   : > { %p765_p12 = scmp.ge.s32.totalorder %s577_s19, 2  ;;  %s297_s5 = scalar_lea.sflag [#allocation5], %s296_s4 }
  0xf0   : > { %p406_p0 = pnand %p765_p12, %p764_p11 }
  0xf2   : > { %p407_p1 = pneg %p406_p0 }
  0xf4   : > { %552 = dma.done.wait (%p407_p1), %s297_s5, 128  }
  0xf5   : > { %554 = vsyncadd (%p407_p1), %s297_s5, 4294967168  ;;  %s20_s19 = sadd.s32 1, %s577_s19   ;;  %s766_s14 = smov %s561_s15 }
  0xf6   : > { %p17_p2 = scmp.ge.s32.totalorder %s20_s19, 4   ;;  %s767_s15 = smov %s565_s16 }
  0xf7   : > { %s768_s16 = smov %s661_s27  ;;  %s769_s17 = smov %s573_s18 }
  0xf8   : > { %s770_s18 = smov %s772_s21  ;;  %19 = sbr.rel (!%p17_p2) target bundleno = 8 (0x8), region = 80 }
  0xfd   :  { %302 = vsyncpa [#allocation4], 1 }
  0xfe   :  { %304 = vsyncpa [#allocation4 + $0x1], 1 }
  0xff   :  { %305 = vsyncpa [#allocation5], 1 }
 0x100   :  { %307 = vsyncpa [#allocation5 + $0x1], 1 }

</bundles_post_ra>
